<compile_context>
chip_gen: v7x
topology: tpu7x:2x2x1
jax: 0.10.0
libtpu: 0.0.40
codegen_flags: <defaults>
</compile_context>

<pallas_src>
import functools

import jax
import jax.numpy as jnp
from jax.experimental import pallas as pl
from jax.experimental.pallas import tpu as pltpu


# ----------------------------- config ------------------------------------
class Config:
    hidden_size = 32
    intermediate_size = 128          # 4 * hidden, lane-width-128 contraction
    layer_norm_eps = 1e-12
    hidden_dropout_prob = 0.0        # eval mode: dropout is a no-op


# ----------------------------- pallas kernel ------------------------------
def _bert_output_kernel(x_ref, res_ref, w_ref, b_ref, g_ref, beta_ref, o_ref,
                        *, eps):
    # Dense on the MXU: operands in the stored dtype (e.g. bf16), f32 accumulate.
    y = jnp.dot(x_ref[...], w_ref[...], preferred_element_type=jnp.float32)
    # Bias + residual add in f32.  Dropout is the identity (eval mode).
    z = y + b_ref[...].astype(jnp.float32) + res_ref[...].astype(jnp.float32)
    # BertLayerNorm (TF style: eps inside the sqrt), all math in f32.
    u = jnp.mean(z, axis=-1, keepdims=True)
    zc = z - u
    s = jnp.mean(zc * zc, axis=-1, keepdims=True)
    inv = jax.lax.rsqrt(s + eps)
    o_ref[...] = (g_ref[...].astype(jnp.float32) * (zc * inv)
                  + beta_ref[...].astype(jnp.float32)).astype(o_ref.dtype)


# ----------------------------- wrapper ------------------------------------
def bert_output(hidden_states, input_tensor, params, cfg):
    """hidden_states: (B, S, intermediate), input_tensor: (B, S, hidden)."""
    if getattr(cfg, "hidden_dropout_prob", 0.0) != 0.0:
        # TODO(synk): training-mode dropout (PRNG mask via pltpu.prng_*) not implemented.
        raise NotImplementedError("kernel implements eval-mode forward (dropout = identity)")

    B, S, K = hidden_states.shape
    H = input_tensor.shape[-1]
    N = B * S

    # Flatten tokens -> one 2-D matmul (single clean MXU matmul per tile).
    x2 = hidden_states.reshape(N, K)
    r2 = input_tensor.reshape(N, H)

    w = params['dense_w']            # (K, H)
    b = params['dense_b']            # (1, H)
    g = params['ln_w']               # (1, H)
    beta = params['ln_b']            # (1, H)

    out_dtype = hidden_states.dtype

    # ---- row-tile selection (no padding, no tm-halving cliff) -------------
    # Large tiles amortize the ~0.35us per-grid-step overhead and get close to
    # the HBM roofline.  For small N we still split into >=2 row tiles so a
    # v7x chip (2 TensorCores) shards the 'parallel' axis across both cores.
    tm_target = 512
    if N >= 2 * tm_target:
        tm = tm_target
    else:
        half = -(-N // 2)                       # ceil(N / 2)
        tm = min(tm_target, max(8, ((half + 7) // 8) * 8))   # sublane-aligned
    num_tiles = pl.cdiv(N, tm)

    itemsize_in = jnp.dtype(x2.dtype).itemsize
    itemsize_res = jnp.dtype(r2.dtype).itemsize
    itemsize_w = jnp.dtype(w.dtype).itemsize
    itemsize_out = jnp.dtype(out_dtype).itemsize
    cost = pl.CostEstimate(
        flops=2 * N * K * H + 10 * N * H,
        transcendentals=N,                       # one rsqrt per row
        bytes_accessed=(N * K * itemsize_in
                        + N * H * itemsize_res
                        + N * H * itemsize_out
                        + K * H * itemsize_w
                        + 3 * H * itemsize_w),
    )

    kernel = functools.partial(_bert_output_kernel, eps=cfg.layer_norm_eps)

    def build_call(const_kwargs):
        in_specs = [
            pl.BlockSpec((tm, K), lambda i: (i, 0)),                   # x row-tile
            pl.BlockSpec((tm, H), lambda i: (i, 0)),                   # residual tile
            pl.BlockSpec((K, H), lambda i: (0, 0), **const_kwargs),    # dense W (resident)
            pl.BlockSpec((1, H), lambda i: (0, 0), **const_kwargs),    # dense bias
            pl.BlockSpec((1, H), lambda i: (0, 0), **const_kwargs),    # LN gamma
            pl.BlockSpec((1, H), lambda i: (0, 0), **const_kwargs),    # LN beta
        ]
        return pl.pallas_call(
            kernel,
            out_shape=jax.ShapeDtypeStruct((N, H), out_dtype),
            grid=(num_tiles,),
            in_specs=in_specs,
            out_specs=pl.BlockSpec((tm, H), lambda i: (i, 0)),
            compiler_params=pltpu.CompilerParams(
                dimension_semantics=("parallel",),     # shard row tiles across TCs
                vmem_limit_bytes=48 * 1024 * 1024),    # explicit, fits v7x 64 MiB VMEM
            cost_estimate=cost,
        )

    try:
        # Constant-index operands don't need double buffering: halves their
        # VMEM footprint (matters for real BERT-size W on v7x / v5e).
        out = build_call(dict(pipeline_mode=pl.Buffered(1)))(x2, r2, w, b, g, beta)
    except Exception:
        # Graceful fallback for JAX versions without pipeline_mode support on
        # a top-level pallas_call BlockSpec (default double buffering).
        out = build_call({})(x2, r2, w, b, g, beta)

    return out.reshape(B, S, H)


# ----------------------------- params --------------------------------------
def init_params(key, cfg, dtype=jnp.float32):
    K, H = cfg.intermediate_size, cfg.hidden_size
    k_w, k_b, k_g, k_beta = jax.random.split(key, 4)
    bound = 1.0 / (K ** 0.5)
    return {
        'dense_w': jax.random.uniform(k_w, (K, H), jnp.float32, -bound, bound).astype(dtype),
        'dense_b': jax.random.uniform(k_b, (1, H), jnp.float32, -bound, bound).astype(dtype),
        'ln_w': (1.0 + 0.1 * jax.random.normal(k_g, (1, H), jnp.float32)).astype(dtype),
        'ln_b': (0.1 * jax.random.normal(k_beta, (1, H), jnp.float32)).astype(dtype),
    }


# ----------------------------- reference (pure JAX, f32) -------------------
def bert_output_ref(hidden_states, input_tensor, params, cfg):
    y = jnp.einsum('bsk,kh->bsh', hidden_states, params['dense_w']) + params['dense_b']
    z = y + input_tensor
    u = jnp.mean(z, axis=-1, keepdims=True)
    s = jnp.mean((z - u) ** 2, axis=-1, keepdims=True)
    zn = (z - u) / jnp.sqrt(s + cfg.layer_norm_eps)
    return params['ln_w'] * zn + params['ln_b']


# ----------------------------- main -----------------------------------------
if __name__ == "__main__":
    cfg = Config()
    key = jax.random.PRNGKey(0)
    k_p, k_x, k_r = jax.random.split(key, 3)

    B, S = 2, 8
    act_dtype = jnp.bfloat16     # ship activations/weights from HBM in bf16
    hidden_states = jax.random.normal(
        k_x, (B, S, cfg.intermediate_size), jnp.float32).astype(act_dtype)
    input_tensor = jax.random.normal(
        k_r, (B, S, cfg.hidden_size), jnp.float32).astype(act_dtype)

    params = init_params(k_p, cfg, dtype=act_dtype)

    out = bert_output(hidden_states, input_tensor, params, cfg)
    jax.block_until_ready(out)

    # Reference in f32 using the same bf16-quantized inputs/params.
    params_f32 = jax.tree_util.tree_map(lambda p: p.astype(jnp.float32), params)
    ref = bert_output_ref(hidden_states.astype(jnp.float32),
                          input_tensor.astype(jnp.float32), params_f32, cfg)

    assert out.shape == (B, S, cfg.hidden_size)
    assert out.dtype == act_dtype, "output dtype should follow the input dtype"
    assert jnp.allclose(out.astype(jnp.float32), ref, atol=3e-2, rtol=3e-2), \
        "mismatch vs reference"

    print("KERNEL_OK")
</pallas_src>

<mosaic_0001>
module attributes {stable_mosaic.version = 11 : i64} {
  func.func @_bert_output_kernel(%arg0: i32, %arg1: memref<8x128xbf16, #tpu.memory_space<vmem>>, %arg2: memref<8x32xbf16, #tpu.memory_space<vmem>>, %arg3: memref<128x32xbf16, #tpu.memory_space<vmem>>, %arg4: memref<1x32xbf16, #tpu.memory_space<vmem>>, %arg5: memref<1x32xbf16, #tpu.memory_space<vmem>>, %arg6: memref<1x32xbf16, #tpu.memory_space<vmem>>, %arg7: memref<8x32xbf16, #tpu.memory_space<vmem>>) attributes {dimension_semantics = [#tpu.dimension_semantics<parallel>], iteration_bounds = array<i64: 2>, scalar_prefetch = 0 : i64, scratch_operands = 0 : i64, tpu.core_type = #tpu.core_type<tc>, window_params = [{transform_indices = @transform_0, window_bounds = array<i64: 8, 128>}, {transform_indices = @transform_1, window_bounds = array<i64: 8, 32>}, {pipeline_mode = #tpu.pipeline_mode<synchronous>, transform_indices = @transform_2, window_bounds = array<i64: 128, 32>}, {pipeline_mode = #tpu.pipeline_mode<synchronous>, transform_indices = @transform_3, window_bounds = array<i64: 1, 32>}, {pipeline_mode = #tpu.pipeline_mode<synchronous>, transform_indices = @transform_4, window_bounds = array<i64: 1, 32>}, {pipeline_mode = #tpu.pipeline_mode<synchronous>, transform_indices = @transform_5, window_bounds = array<i64: 1, 32>}, {transform_indices = @transform_6, window_bounds = array<i64: 8, 32>}]} {
    %c0 = arith.constant 0 : index
    %c0_0 = arith.constant 0 : index
    %0 = vector.load %arg1[%c0, %c0_0] : memref<8x128xbf16, #tpu.memory_space<vmem>>, vector<8x128xbf16>
    %c0_1 = arith.constant 0 : index
    %c0_2 = arith.constant 0 : index
    %1 = vector.load %arg3[%c0_1, %c0_2] : memref<128x32xbf16, #tpu.memory_space<vmem>>, vector<128x32xbf16>
    %cst = arith.constant dense<0.000000e+00> : vector<8x32xf32>
    %2 = tpu.matmul %0, %1, %cst {dimension_numbers = #tpu.dot_dimension_numbers<[1], [0], [0], [1], [0, 0, 1, 1], [], []>} : vector<8x128xbf16>, vector<128x32xbf16>, vector<8x32xf32> -> vector<8x32xf32>
    %c0_3 = arith.constant 0 : index
    %c0_4 = arith.constant 0 : index
    %3 = vector.load %arg4[%c0_3, %c0_4] : memref<1x32xbf16, #tpu.memory_space<vmem>>, vector<1x32xbf16>
    %4 = arith.extf %3 : vector<1x32xbf16> to vector<1x32xf32>
    %5 = vector.broadcast %4 : vector<1x32xf32> to vector<8x32xf32>
    %6 = arith.addf %2, %5 : vector<8x32xf32>
    %c0_5 = arith.constant 0 : index
    %c0_6 = arith.constant 0 : index
    %7 = vector.load %arg2[%c0_5, %c0_6] : memref<8x32xbf16, #tpu.memory_space<vmem>>, vector<8x32xbf16>
    %8 = arith.extf %7 : vector<8x32xbf16> to vector<8x32xf32>
    %9 = arith.addf %6, %8 : vector<8x32xf32>
    %cst_7 = arith.constant dense<0.000000e+00> : vector<8xf32>
    %10 = vector.multi_reduction <add>, %9, %cst_7 [1] : vector<8x32xf32> to vector<8xf32>
    %11 = vector.shape_cast %10 : vector<8xf32> to vector<8x1xf32>
    %cst_8 = arith.constant 3.200000e+01 : f32
    %12 = vector.broadcast %cst_8 : f32 to vector<8x1xf32>
    %13 = arith.divf %11, %12 : vector<8x1xf32>
    %14 = vector.broadcast %13 : vector<8x1xf32> to vector<8x32xf32>
    %15 = arith.subf %9, %14 : vector<8x32xf32>
    %16 = arith.mulf %15, %15 : vector<8x32xf32>
    %cst_9 = arith.constant dense<0.000000e+00> : vector<8xf32>
    %17 = vector.multi_reduction <add>, %16, %cst_9 [1] : vector<8x32xf32> to vector<8xf32>
    %18 = vector.shape_cast %17 : vector<8xf32> to vector<8x1xf32>
    %cst_10 = arith.constant 3.200000e+01 : f32
    %19 = vector.broadcast %cst_10 : f32 to vector<8x1xf32>
    %20 = arith.divf %18, %19 : vector<8x1xf32>
    %cst_11 = arith.constant 9.99999996E-13 : f32
    %21 = vector.broadcast %cst_11 : f32 to vector<8x1xf32>
    %22 = arith.addf %20, %21 : vector<8x1xf32>
    %23 = math.rsqrt %22 : vector<8x1xf32>
    %c0_12 = arith.constant 0 : index
    %c0_13 = arith.constant 0 : index
    %24 = vector.load %arg5[%c0_12, %c0_13] : memref<1x32xbf16, #tpu.memory_space<vmem>>, vector<1x32xbf16>
    %25 = arith.extf %24 : vector<1x32xbf16> to vector<1x32xf32>
    %26 = vector.broadcast %23 : vector<8x1xf32> to vector<8x32xf32>
    %27 = arith.mulf %15, %26 : vector<8x32xf32>
    %28 = vector.broadcast %25 : vector<1x32xf32> to vector<8x32xf32>
    %29 = arith.mulf %28, %27 : vector<8x32xf32>
    %c0_14 = arith.constant 0 : index
    %c0_15 = arith.constant 0 : index
    %30 = vector.load %arg6[%c0_14, %c0_15] : memref<1x32xbf16, #tpu.memory_space<vmem>>, vector<1x32xbf16>
    %31 = arith.extf %30 : vector<1x32xbf16> to vector<1x32xf32>
    %32 = vector.broadcast %31 : vector<1x32xf32> to vector<8x32xf32>
    %33 = arith.addf %29, %32 : vector<8x32xf32>
    %34 = arith.truncf %33 : vector<8x32xf32> to vector<8x32xbf16>
    %c0_16 = arith.constant 0 : index
    %c0_17 = arith.constant 0 : index
    %35 = vector.load %arg7[%c0_16, %c0_17] : memref<8x32xbf16, #tpu.memory_space<vmem>>, vector<8x32xbf16>
    tpu.vector_store %arg7[%c0_16, %c0_17], %34 {strides = array<i32>} : memref<8x32xbf16, #tpu.memory_space<vmem>>, vector<8x32xbf16>,
    return
  }
  func.func @transform_0(%arg0: i32) -> (i32, i32) {
    %c0_i32 = arith.constant 0 : i32
    %c0_i32_0 = arith.constant 0 : i32
    return %arg0, %c0_i32 : i32, i32
  }
  func.func @transform_1(%arg0: i32) -> (i32, i32) {
    %c0_i32 = arith.constant 0 : i32
    %c0_i32_0 = arith.constant 0 : i32
    return %arg0, %c0_i32 : i32, i32
  }
  func.func @transform_2(%arg0: i32) -> (i32, i32) {
    %c0_i32 = arith.constant 0 : i32
    %c0_i32_0 = arith.constant 0 : i32
    %c0_i32_1 = arith.constant 0 : i32
    return %c0_i32, %c0_i32_0 : i32, i32
  }
  func.func @transform_3(%arg0: i32) -> (i32, i32) {
    %c0_i32 = arith.constant 0 : i32
    %c0_i32_0 = arith.constant 0 : i32
    %c0_i32_1 = arith.constant 0 : i32
    return %c0_i32, %c0_i32_0 : i32, i32
  }
  func.func @transform_4(%arg0: i32) -> (i32, i32) {
    %c0_i32 = arith.constant 0 : i32
    %c0_i32_0 = arith.constant 0 : i32
    %c0_i32_1 = arith.constant 0 : i32
    return %c0_i32, %c0_i32_0 : i32, i32
  }
  func.func @transform_5(%arg0: i32) -> (i32, i32) {
    %c0_i32 = arith.constant 0 : i32
    %c0_i32_0 = arith.constant 0 : i32
    %c0_i32_1 = arith.constant 0 : i32
    return %c0_i32, %c0_i32_0 : i32, i32
  }
  func.func @transform_6(%arg0: i32) -> (i32, i32) {
    %c0_i32 = arith.constant 0 : i32
    %c0_i32_0 = arith.constant 0 : i32
    return %arg0, %c0_i32 : i32, i32
  }
}

module attributes {stable_mosaic.version = 11 : i64} {
  func.func @_bert_output_kernel(%arg0: i32, %arg1: memref<8x128xbf16, #tpu.memory_space<vmem>>, %arg2: memref<8x32xbf16, #tpu.memory_space<vmem>>, %arg3: memref<128x32xbf16, #tpu.memory_space<vmem>>, %arg4: memref<1x32xbf16, #tpu.memory_space<vmem>>, %arg5: memref<1x32xbf16, #tpu.memory_space<vmem>>, %arg6: memref<1x32xbf16, #tpu.memory_space<vmem>>, %arg7: memref<8x32xbf16, #tpu.memory_space<vmem>>) attributes {dimension_semantics = [#tpu.dimension_semantics<parallel>], iteration_bounds = array<i64: 2>, scalar_prefetch = 0 : i64, scratch_operands = 0 : i64, tpu.core_type = #tpu.core_type<tc>, window_params = [{transform_indices = @transform_0, window_bounds = array<i64: 8, 128>}, {transform_indices = @transform_1, window_bounds = array<i64: 8, 32>}, {pipeline_mode = #tpu.pipeline_mode<synchronous>, transform_indices = @transform_2, window_bounds = array<i64: 128, 32>}, {pipeline_mode = #tpu.pipeline_mode<synchronous>, transform_indices = @transform_3, window_bounds = array<i64: 1, 32>}, {pipeline_mode = #tpu.pipeline_mode<synchronous>, transform_indices = @transform_4, window_bounds = array<i64: 1, 32>}, {pipeline_mode = #tpu.pipeline_mode<synchronous>, transform_indices = @transform_5, window_bounds = array<i64: 1, 32>}, {transform_indices = @transform_6, window_bounds = array<i64: 8, 32>}]} {
    %c0 = arith.constant 0 : index
    %c0_0 = arith.constant 0 : index
    %0 = vector.load %arg1[%c0, %c0_0] : memref<8x128xbf16, #tpu.memory_space<vmem>>, vector<8x128xbf16>
    %c0_1 = arith.constant 0 : index
    %c0_2 = arith.constant 0 : index
    %1 = vector.load %arg3[%c0_1, %c0_2] : memref<128x32xbf16, #tpu.memory_space<vmem>>, vector<128x32xbf16>
    %cst = arith.constant dense<0.000000e+00> : vector<8x32xf32>
    %2 = tpu.matmul %0, %1, %cst {dimension_numbers = #tpu.dot_dimension_numbers<[1], [0], [0], [1], [0, 0, 1, 1], [], []>} : vector<8x128xbf16>, vector<128x32xbf16>, vector<8x32xf32> -> vector<8x32xf32>
    %c0_3 = arith.constant 0 : index
    %c0_4 = arith.constant 0 : index
    %3 = vector.load %arg4[%c0_3, %c0_4] : memref<1x32xbf16, #tpu.memory_space<vmem>>, vector<1x32xbf16>
    %4 = arith.extf %3 : vector<1x32xbf16> to vector<1x32xf32>
    %5 = vector.broadcast %4 : vector<1x32xf32> to vector<8x32xf32>
    %6 = arith.addf %2, %5 : vector<8x32xf32>
    %c0_5 = arith.constant 0 : index
    %c0_6 = arith.constant 0 : index
    %7 = vector.load %arg2[%c0_5, %c0_6] : memref<8x32xbf16, #tpu.memory_space<vmem>>, vector<8x32xbf16>
    %8 = arith.extf %7 : vector<8x32xbf16> to vector<8x32xf32>
    %9 = arith.addf %6, %8 : vector<8x32xf32>
    %cst_7 = arith.constant dense<0.000000e+00> : vector<8xf32>
    %10 = vector.multi_reduction <add>, %9, %cst_7 [1] : vector<8x32xf32> to vector<8xf32>
    %11 = vector.shape_cast %10 : vector<8xf32> to vector<8x1xf32>
    %cst_8 = arith.constant 3.200000e+01 : f32
    %12 = vector.broadcast %cst_8 : f32 to vector<8x1xf32>
    %13 = arith.divf %11, %12 : vector<8x1xf32>
    %14 = vector.broadcast %13 : vector<8x1xf32> to vector<8x32xf32>
    %15 = arith.subf %9, %14 : vector<8x32xf32>
    %16 = arith.mulf %15, %15 : vector<8x32xf32>
    %cst_9 = arith.constant dense<0.000000e+00> : vector<8xf32>
    %17 = vector.multi_reduction <add>, %16, %cst_9 [1] : vector<8x32xf32> to vector<8xf32>
    %18 = vector.shape_cast %17 : vector<8xf32> to vector<8x1xf32>
    %cst_10 = arith.constant 3.200000e+01 : f32
    %19 = vector.broadcast %cst_10 : f32 to vector<8x1xf32>
    %20 = arith.divf %18, %19 : vector<8x1xf32>
    %cst_11 = arith.constant 9.99999996E-13 : f32
    %21 = vector.broadcast %cst_11 : f32 to vector<8x1xf32>
    %22 = arith.addf %20, %21 : vector<8x1xf32>
    %23 = math.rsqrt %22 : vector<8x1xf32>
    %c0_12 = arith.constant 0 : index
    %c0_13 = arith.constant 0 : index
    %24 = vector.load %arg5[%c0_12, %c0_13] : memref<1x32xbf16, #tpu.memory_space<vmem>>, vector<1x32xbf16>
    %25 = arith.extf %24 : vector<1x32xbf16> to vector<1x32xf32>
    %26 = vector.broadcast %23 : vector<8x1xf32> to vector<8x32xf32>
    %27 = arith.mulf %15, %26 : vector<8x32xf32>
    %28 = vector.broadcast %25 : vector<1x32xf32> to vector<8x32xf32>
    %29 = arith.mulf %28, %27 : vector<8x32xf32>
    %c0_14 = arith.constant 0 : index
    %c0_15 = arith.constant 0 : index
    %30 = vector.load %arg6[%c0_14, %c0_15] : memref<1x32xbf16, #tpu.memory_space<vmem>>, vector<1x32xbf16>
    %31 = arith.extf %30 : vector<1x32xbf16> to vector<1x32xf32>
    %32 = vector.broadcast %31 : vector<1x32xf32> to vector<8x32xf32>
    %33 = arith.addf %29, %32 : vector<8x32xf32>
    %34 = arith.truncf %33 : vector<8x32xf32> to vector<8x32xbf16>
    %c0_16 = arith.constant 0 : index
    %c0_17 = arith.constant 0 : index
    %35 = vector.load %arg7[%c0_16, %c0_17] : memref<8x32xbf16, #tpu.memory_space<vmem>>, vector<8x32xbf16>
    tpu.vector_store %arg7[%c0_16, %c0_17], %34 {strides = array<i32>} : memref<8x32xbf16, #tpu.memory_space<vmem>>, vector<8x32xbf16>,
    return
  }
  func.func @transform_0(%arg0: i32) -> (i32, i32) {
    %c0_i32 = arith.constant 0 : i32
    %c0_i32_0 = arith.constant 0 : i32
    return %arg0, %c0_i32 : i32, i32
  }
  func.func @transform_1(%arg0: i32) -> (i32, i32) {
    %c0_i32 = arith.constant 0 : i32
    %c0_i32_0 = arith.constant 0 : i32
    return %arg0, %c0_i32 : i32, i32
  }
  func.func @transform_2(%arg0: i32) -> (i32, i32) {
    %c0_i32 = arith.constant 0 : i32
    %c0_i32_0 = arith.constant 0 : i32
    %c0_i32_1 = arith.constant 0 : i32
    return %c0_i32, %c0_i32_0 : i32, i32
  }
  func.func @transform_3(%arg0: i32) -> (i32, i32) {
    %c0_i32 = arith.constant 0 : i32
    %c0_i32_0 = arith.constant 0 : i32
    %c0_i32_1 = arith.constant 0 : i32
    return %c0_i32, %c0_i32_0 : i32, i32
  }
  func.func @transform_4(%arg0: i32) -> (i32, i32) {
    %c0_i32 = arith.constant 0 : i32
    %c0_i32_0 = arith.constant 0 : i32
    %c0_i32_1 = arith.constant 0 : i32
    return %c0_i32, %c0_i32_0 : i32, i32
  }
  func.func @transform_5(%arg0: i32) -> (i32, i32) {
    %c0_i32 = arith.constant 0 : i32
    %c0_i32_0 = arith.constant 0 : i32
    %c0_i32_1 = arith.constant 0 : i32
    return %c0_i32, %c0_i32_0 : i32, i32
  }
  func.func @transform_6(%arg0: i32) -> (i32, i32) {
    %c0_i32 = arith.constant 0 : i32
    %c0_i32_0 = arith.constant 0 : i32
    return %arg0, %c0_i32 : i32, i32
  }
}

</mosaic_0001>

<bundles_post_ra>
// kernel: tpu_custom_call.1
= control target key start
LH: loop header
LB: loop body
LE: loop exit
PB: predicated region body
PF: predicated region fallthrough
CT: control target
= control target key end

     0   :  { %11 = vsyncpa [#allocation3], 0  ;;  %s833_s0 = inlined_call_operand.vmem [shape: bf16[16,128], index: 0, kind: input, shape index: {}]   ;;  %s834_s1 = inlined_call_operand.vmem [shape: bf16[16,32], index: 1, kind: input, shape index: {}]   ;;  %s835_s2 = inlined_call_operand.vmem [shape: bf16[128,32], index: 2, kind: input, shape index: {}]   ;;  %s836_s3 = inlined_call_operand.vmem [shape: bf16[1,32], index: 3, kind: input, shape index: {}]   ;;  %s837_s4 = inlined_call_operand.vmem [shape: bf16[1,32], index: 4, kind: input, shape index: {}]   ;;  %s838_s5 = inlined_call_operand.vmem [shape: bf16[1,32], index: 5, kind: input, shape index: {}]   ;;  %s839_s6 = inlined_call_operand.hbm [shape: bf16[16,32], index: 6, kind: output, shape index: {}]  }
   0x1   :  { %13 = vsyncpa [#allocation3 + $0x1], 0  ;;  %s697_s21 = smov 0   ;;  %s699_s22 = smov 0  }
   0x2   :  { %s701_s23 = smov 0   ;;  %s703_s24 = smov 0  }
   0x3 LB: > { %s718_s25 = sadd.s32 4294967295, %s657_s24   ;;  %s496_s26 = sadd.s32 4294967294, %s657_s24   ;;  %s657_s24 = sphi %s703_s24, %s845_s24   ;;  %s653_s23 = sphi %s701_s23, %s844_s23   ;;  %s649_s22 = sphi %s699_s22, %s843_s22   ;;  %s645_s21 = sphi %s697_s21, %s842_s21  }
   0x4   : > { %s722_s27 = sadd.s32 1, %s657_s24   ;;  %s162_s28 = sadd.s32 1, %s653_s23 }
   0x5   : > { %s159_s29 = ssub.s32 %s657_s24, %s722_s27  ;;  %p172_p0 = scmp.ne.s32.totalorder %s653_s23, %s649_s22 }
   0x6   : > { %p160_p1 = scmp.eq.s32.totalorder %s159_s29, 0  ;;  %p173_p2 = scmp.eq.s32.totalorder %s718_s25, 1 }
   0x7   : > { %p178_p3 = scmp.ne.s32.totalorder %s649_s22, %s645_s21  ;;  %p179_p4 = scmp.eq.s32.totalorder %s496_s26, 1 }
   0x8   : > { %s733_s30 = scalar_select %p160_p1, %s653_s23, %s162_s28  }
   0x9   : > { %p735_p5 = por %p173_p2, %p172_p0  ;;  %p739_p6 = por %p179_p4, %p178_p3 }
   0xa   : > { %p499_p7 = scmp.ge.s32.totalorder %s657_s24, 1  ;;  %p223_p8 = scmp.lt.s32.totalorder %s657_s24, 3 }
   0xc   : > { %p224_p9 = pnand %p499_p7, %p223_p8 }
   0xd   : > { %v585_v0 = vld [vmem:[%s835_s2] sm:$0xff] (!%p224_p9)   ;;  %v659_v1 = vmov (!%p224_p9), 0.0   ;;  %v586_v2 = vld [vmem:[%s835_s2 + $0x8] sm:$0xff] (!%p224_p9)   ;;  %vm660_vm0 = vmmov (!%p224_p9), 0   ;;  %v587_v3 = vld [vmem:[%s835_s2 + $0x10] sm:$0xff] (!%p224_p9)   ;;  %p256_p10 = scmp.lt.s32.totalorder (!%p224_p9), %s718_s25, 1  ;;  %v284_v10 = vlaneseq (!%p224_p9) }
   0xe   : > { %227 = sbr.rel (%p224_p9) target bundleno = 591 (0x24f), region = 44  ;;  %524 = vmatprep.subr.bf16.mxu0 (!%p224_p9), %v659_v1  ;;  %540 = vmatprep.mubr.msk.bf16.mxu0 (!%p224_p9), %vm660_vm0, %v659_v1  ;;  %v588_v4 = vld [vmem:[%s835_s2 + $0x18] sm:$0xff] (!%p224_p9)   ;;  %v589_v5 = vld [vmem:[%s835_s2 + $0x20] sm:$0xff] (!%p224_p9)   ;;  %v590_v6 = vld [vmem:[%s835_s2 + $0x28] sm:$0xff] (!%p224_p9)   ;;  %vm379_vm1 = vcmask (!%p224_p9), 261120   ;;  %s512_s11 = sshll.u32 (!%p224_p9), %s718_s25, 6 }
   0xf   : > { %525 = vmatpush3.bf16.msra.mxu0 (!%p224_p9), %v585_v0  ;;  %v591_v7 = vld [vmem:[%s835_s2 + $0x30] sm:$0xff] (!%p224_p9)   ;;  %v592_v8 = vld [vmem:[%s835_s2 + $0x38] sm:$0xff] (!%p224_p9)   ;;  %v285_v11 = vshrl.u32 (!%p224_p9), %v284_v10, 7  ;;  %v282_v12 = vld [vmem:[%s836_s3] sm:$0x1] (!%p224_p9)  ;;  %vm409_vm2 = vcmask (!%p224_p9), 257024   ;;  %s791_s16 = scalar_lea.hbm (!%p224_p9), %s839_s6, %s512_s11 }
  0x10   : > { %526 = vmatprep.subr.bf16.mxu0 (!%p224_p9), %v659_v1  ;;  %v283_v13 = vunpack.c.l.bf16 (!%p224_p9), %v282_v12  ;;  %v393_v33 = vld [vmem:[%s837_s4] sm:$0x1] (!%p224_p9) }
  0x11   : > { %v286_v14 = vsub.s32 (!%p224_p9), 0, %v285_v11  ;;  %v401_v34 = vld [vmem:[%s838_s5] sm:$0x1] (!%p224_p9)  ;;  %v394_v35 = vunpack.c.l.bf16 (!%p224_p9), %v393_v33 }
  0x12   : > { %v402_v36 = vunpack.c.l.bf16 (!%p224_p9), %v401_v34 }
  0x13   : > { %527 = vmatpush3.bf16.msra.mxu0 (!%p224_p9), %v586_v2  ;;  %v287_v16 = vrot.slane (!%p224_p9), %v283_v13, %v286_v14  ;;  %v399_v37 = vrot.slane (!%p224_p9), %v394_v35, %v286_v14 }
  0x14   : > { %528 = vmatprep.subr.bf16.mxu0 (!%p224_p9), %v659_v1  ;;  %v406_v40 = vrot.slane (!%p224_p9), %v402_v36, %v286_v14 }
  0x15   : > { %s257_s26 = scalar_select %p256_p10, %s718_s25, 1 }
  0x16   : > { %s661_s25 = smov [#allocation2]  }
  0x17   : > { %529 = vmatpush3.bf16.msra.mxu0 %v587_v3  ;;  %s501_s9 = sshll.u32 %s257_s26, 2 }
  0x18   : > { %530 = vmatprep.subr.bf16.mxu0 %v659_v1  ;;  %s259_s14 = scalar_lea.vmem %s833_s0, %s501_s9  ;;  %s263_s19 = scalar_lea.vmem %s834_s1, %s501_s9 }
  0x19   : > { %v265_v9 = vld [vmem:[%s259_s14] sm:$0xf]  ;;  %s253_s9 = sand.u32 1, %s649_s22  }
  0x1a   : > { %v376_v15 = vld [vmem:[%s263_s19] sm:$0xf]  ;;  %s500_s10 = sshll.u32 %s253_s9, 2  ;;  %s412_s17 = scalar_lea.sflag [#allocation3], %s253_s9 }
  0x1b   : > { %531 = vmatpush3.bf16.msra.mxu0 %v588_v4  ;;  %v377_v17 = vunpack.c.l.bf16 %v376_v15  ;;  %s255_s12 = scalar_lea.vmem [#allocation2], %s500_s10  ;;  %s599_s19 = sshll.u32 %s661_s25, 4  ;;  %s600_s19 = int_to_ptr.vmem [resolvable:$false] %s599_s19 }
  0x1c   : > { %532 = vmatprep.subr.bf16.mxu0 %v659_v1  ;;  %s425_s13 = sshll.u32 %s255_s12, 4  ;;  %s601_s20 = scalar_lea.vmem %s600_s19, 128  ;;  %s793_s13 = int_to_ptr.vmem [resolvable:$true] %s425_s13 }
  0x1d   : > { %s595_s18 = scalar_lea.vmem %s793_s13, 64  ;;  %p602_p0 = scmp.lt.s32.totalorder %s793_s13, %s600_s19 }
  0x1e   : > { %p596_p11 = scmp.ne.s32.totalorder %s793_s13, %s595_s18  ;;  %p603_p1 = scmp.lt.s32.totalorder %s601_s20, %s595_s18 }
  0x1f   : > { %533 = vmatpush3.bf16.msra.mxu0 %v589_v5 }
  0x20   : > { %534 = vmatprep.subr.bf16.mxu0 %v659_v1  ;;  %p597_p12 = pnand %p596_p11, %p735_p5  ;;  %p604_p2 = por %p603_p1, %p602_p0 }
  0x22   : > { %p598_p13 = pneg %p597_p12 }
  0x23   : > { %535 = vmatpush3.bf16.msra.mxu0 %v590_v6 }
  0x24   : > { %536 = vmatprep.subr.bf16.mxu0 %v659_v1  ;;  %p605_p3 = pnand %p604_p2, %p598_p13 }
  0x27   : > { %537 = vmatpush3.bf16.msra.mxu0 %v591_v7 }
  0x28   : > { %538 = vmatprep.subr.bf16.mxu0 %v659_v1 }
  0x2b   : > { %539 = vmatpush3.bf16.msra.mxu0 %v592_v8 }
  0x2e   : > { %541 = vmatmul.mubr.bf16.vlgmr.msra.gmra.mrb[0].mxu0 %v265_v9 }
 0x101   : > { %v370_v18 = vpop.f32.mrb[0].mxu0 }
 0x102   : > { %v371_v19 = vadd.f32 %v370_v18, %v287_v16  ;;  %v542_v20 = vpop.f32.mrb[1].mxu0 }
 0x103   : > { %v373_v21 = vpop.f32.mrb[2].mxu0 }
 0x104   : > { %v543_v22 = vpop.f32.mrb[3].mxu0  ;;  %v378_v23 = vadd.f32 %v377_v17, %v371_v19 }
 0x106   : > { %v380_v24 = vsel %vm379_vm1, %v378_v23, 0.0 }
 0x107   : > { %381 = vadd.xlane.f32.xlu0 %v380_v24 }
 0x194   : > { %v382_v25 = vpop.xlane.xlu0 %381 }
 0x195   : > { %v384_v26 = vmul.f32 0.03125, %v382_v25 }
 0x197   : > { %v385_v27 = vsub.f32 %v378_v23, %v384_v26 }
 0x199   : > { %v386_v28 = vmul.f32 %v385_v27, %v385_v27 }
 0x19b   : > { %v387_v29 = vsel %vm379_vm1, %v386_v28, 0.0 }
 0x19c   : > { %388 = vadd.xlane.f32.xlu0 %v387_v29 }
 0x229   : > { %v389_v30 = vpop.xlane.xlu0 %388 }
 0x22a   : > { %v390_v31 = vmul.f32 0.03125, %v389_v30 }
 0x22c   : > { %v391_v32 = vadd.f32 1e-12, %v390_v31 }
 0x22e   : > { %593 = vrsqrt.f32 %v391_v32 }
 0x238   : > { %v594_v38 = vpop.eup %593 }
 0x239   : > { %v395_v39 = vmul.f32 %v594_v38, %v385_v27 }
 0x23b   : > { %v400_v41 = vmul.f32 %v399_v37, %v395_v39 }
 0x23d   : > { %v407_v42 = vadd.f32 %v406_v40, %v400_v41 }
 0x23f   : > { %v408_v43 = vpack.c.bf16 %v407_v42, %v407_v42 }
 0x241   : > { %410 = vst.msk [vmem:[%s255_s12] sm:$0xf] %vm409_vm2, %v408_v43 }
 0x242   : > { %608 = shalt.err (!%p605_p3)
}
 0x243   : > { %s609_s26 = scalar_lea.hbm %s791_s16, 64  ;;  %s613_s9 = scalar_lea.hbm %s839_s6, 128 }
 0x244   : > { %p610_p4 = scmp.ne.s32.totalorder %s791_s16, %s609_s26  ;;  %p614_p9 = scmp.lt.u32.totalorder %s791_s16, %s839_s6 }
 0x245   : > { %p615_p10 = scmp.lt.u32.totalorder %s613_s9, %s609_s26  ;;  %p617_p12 = scmp.lt.u32.totalorder %s609_s26, %s791_s16 }
 0x246   : > { %p611_p7 = pnand %p610_p4, %p735_p5 }
 0x247   : > { %p616_p11 = por %p615_p10, %p614_p9 }
 0x248   : > { %p612_p8 = pneg %p611_p7 }
 0x249   : > { %p618_p13 = por %p617_p12, %p616_p11 }
 0x24b   : > { %p619_p0 = pnand %p618_p13, %p612_p8 }
 0x24d   : > { %622 = shalt.err (!%p619_p0)
}
 0x24e   : > { %544 = dma.vmem_to_hbm [thread:$0]  (%p735_p5), %s793_s13, 64, %s791_s16, %s412_s17  }
 0x24f PF: > { %p550_p1 = scmp.ge.s32.totalorder %s657_s24, 2  ;;  %s437_s12 = sand.u32 1, %s645_s21  }
 0x250   : > { %s438_s14 = scalar_lea.sflag [#allocation3], %s437_s12 }
 0x251   : > { %p547_p2 = pnand %p550_p1, %p739_p6 }
 0x253   : > { %640 = dma.done.wait (!%p547_p2), %s438_s14, 64  }
 0x254   : > { %642 = vsyncadd (!%p547_p2), %s438_s14, 4294967232  ;;  %p16_p3 = scmp.ge.s32.totalorder %s722_s27, 4   ;;  %s842_s21 = smov %s649_s22 }
 0x255   : > { %s843_s22 = smov %s653_s23  ;;  %s844_s23 = smov %s733_s30 }
 0x256   : > { %s845_s24 = smov %s722_s27  ;;  %18 = sbr.rel (!%p16_p3) target bundleno = 3 (0x3), region = 82 }
 0x25d   :  { %443 = vsyncpa [#allocation3], 1 }
 0x25e   :  { %445 = vsyncpa [#allocation3 + $0x1], 1 }

// kernel: tpu_custom_call.1
= control target key start
LH: loop header
LB: loop body
LE: loop exit
PB: predicated region body
PF: predicated region fallthrough
CT: control target
= control target key end

     0   :  { %11 = vsyncpa [#allocation3], 0  ;;  %s833_s0 = inlined_call_operand.vmem [shape: bf16[16,128], index: 0, kind: input, shape index: {}]   ;;  %s834_s1 = inlined_call_operand.vmem [shape: bf16[16,32], index: 1, kind: input, shape index: {}]   ;;  %s835_s2 = inlined_call_operand.vmem [shape: bf16[128,32], index: 2, kind: input, shape index: {}]   ;;  %s836_s3 = inlined_call_operand.vmem [shape: bf16[1,32], index: 3, kind: input, shape index: {}]   ;;  %s837_s4 = inlined_call_operand.vmem [shape: bf16[1,32], index: 4, kind: input, shape index: {}]   ;;  %s838_s5 = inlined_call_operand.vmem [shape: bf16[1,32], index: 5, kind: input, shape index: {}]   ;;  %s839_s6 = inlined_call_operand.hbm [shape: bf16[16,32], index: 6, kind: output, shape index: {}]  }
   0x1   :  { %13 = vsyncpa [#allocation3 + $0x1], 0  ;;  %s697_s21 = smov 0   ;;  %s699_s22 = smov 0  }
   0x2   :  { %s701_s23 = smov 0   ;;  %s703_s24 = smov 0  }
   0x3 LB: > { %s718_s25 = sadd.s32 4294967295, %s657_s24   ;;  %s496_s26 = sadd.s32 4294967294, %s657_s24   ;;  %s657_s24 = sphi %s703_s24, %s845_s24   ;;  %s653_s23 = sphi %s701_s23, %s844_s23   ;;  %s649_s22 = sphi %s699_s22, %s843_s22   ;;  %s645_s21 = sphi %s697_s21, %s842_s21  }
   0x4   : > { %s722_s27 = sadd.s32 1, %s657_s24   ;;  %s162_s28 = sadd.s32 1, %s653_s23 }
   0x5   : > { %s159_s29 = ssub.s32 %s657_s24, %s722_s27  ;;  %p172_p0 = scmp.ne.s32.totalorder %s653_s23, %s649_s22 }
   0x6   : > { %p160_p1 = scmp.eq.s32.totalorder %s159_s29, 0  ;;  %p173_p2 = scmp.eq.s32.totalorder %s718_s25, 1 }
   0x7   : > { %p178_p3 = scmp.ne.s32.totalorder %s649_s22, %s645_s21  ;;  %p179_p4 = scmp.eq.s32.totalorder %s496_s26, 1 }
   0x8   : > { %s733_s30 = scalar_select %p160_p1, %s653_s23, %s162_s28  }
   0x9   : > { %p735_p5 = por %p173_p2, %p172_p0  ;;  %p739_p6 = por %p179_p4, %p178_p3 }
   0xa   : > { %p499_p7 = scmp.ge.s32.totalorder %s657_s24, 1  ;;  %p223_p8 = scmp.lt.s32.totalorder %s657_s24, 3 }
   0xc   : > { %p224_p9 = pnand %p499_p7, %p223_p8 }
   0xd   : > { %v585_v0 = vld [vmem:[%s835_s2] sm:$0xff] (!%p224_p9)   ;;  %v659_v1 = vmov (!%p224_p9), 0.0   ;;  %v586_v2 = vld [vmem:[%s835_s2 + $0x8] sm:$0xff] (!%p224_p9)   ;;  %vm660_vm0 = vmmov (!%p224_p9), 0   ;;  %v587_v3 = vld [vmem:[%s835_s2 + $0x10] sm:$0xff] (!%p224_p9)   ;;  %p256_p10 = scmp.lt.s32.totalorder (!%p224_p9), %s718_s25, 1  ;;  %v284_v10 = vlaneseq (!%p224_p9) }
   0xe   : > { %227 = sbr.rel (%p224_p9) target bundleno = 591 (0x24f), region = 44  ;;  %524 = vmatprep.subr.bf16.mxu0 (!%p224_p9), %v659_v1  ;;  %540 = vmatprep.mubr.msk.bf16.mxu0 (!%p224_p9), %vm660_vm0, %v659_v1  ;;  %v588_v4 = vld [vmem:[%s835_s2 + $0x18] sm:$0xff] (!%p224_p9)   ;;  %v589_v5 = vld [vmem:[%s835_s2 + $0x20] sm:$0xff] (!%p224_p9)   ;;  %v590_v6 = vld [vmem:[%s835_s2 + $0x28] sm:$0xff] (!%p224_p9)   ;;  %vm379_vm1 = vcmask (!%p224_p9), 261120   ;;  %s512_s11 = sshll.u32 (!%p224_p9), %s718_s25, 6 }
   0xf   : > { %525 = vmatpush3.bf16.msra.mxu0 (!%p224_p9), %v585_v0  ;;  %v591_v7 = vld [vmem:[%s835_s2 + $0x30] sm:$0xff] (!%p224_p9)   ;;  %v592_v8 = vld [vmem:[%s835_s2 + $0x38] sm:$0xff] (!%p224_p9)   ;;  %v285_v11 = vshrl.u32 (!%p224_p9), %v284_v10, 7  ;;  %v282_v12 = vld [vmem:[%s836_s3] sm:$0x1] (!%p224_p9)  ;;  %vm409_vm2 = vcmask (!%p224_p9), 257024   ;;  %s791_s16 = scalar_lea.hbm (!%p224_p9), %s839_s6, %s512_s11 }
  0x10   : > { %526 = vmatprep.subr.bf16.mxu0 (!%p224_p9), %v659_v1  ;;  %v283_v13 = vunpack.c.l.bf16 (!%p224_p9), %v282_v12  ;;  %v393_v33 = vld [vmem:[%s837_s4] sm:$0x1] (!%p224_p9) }
  0x11   : > { %v286_v14 = vsub.s32 (!%p224_p9), 0, %v285_v11  ;;  %v401_v34 = vld [vmem:[%s838_s5] sm:$0x1] (!%p224_p9)  ;;  %v394_v35 = vunpack.c.l.bf16 (!%p224_p9), %v393_v33 }
  0x12   : > { %v402_v36 = vunpack.c.l.bf16 (!%p224_p9), %v401_v34 }
  0x13   : > { %527 = vmatpush3.bf16.msra.mxu0 (!%p224_p9), %v586_v2  ;;  %v287_v16 = vrot.slane (!%p224_p9), %v283_v13, %v286_v14  ;;  %v399_v37 = vrot.slane (!%p224_p9), %v394_v35, %v286_v14 }
  0x14   : > { %528 = vmatprep.subr.bf16.mxu0 (!%p224_p9), %v659_v1  ;;  %v406_v40 = vrot.slane (!%p224_p9), %v402_v36, %v286_v14 }
  0x15   : > { %s257_s26 = scalar_select %p256_p10, %s718_s25, 1 }
  0x16   : > { %s661_s25 = smov [#allocation2]  }
  0x17   : > { %529 = vmatpush3.bf16.msra.mxu0 %v587_v3  ;;  %s501_s9 = sshll.u32 %s257_s26, 2 }
  0x18   : > { %530 = vmatprep.subr.bf16.mxu0 %v659_v1  ;;  %s259_s14 = scalar_lea.vmem %s833_s0, %s501_s9  ;;  %s263_s19 = scalar_lea.vmem %s834_s1, %s501_s9 }
  0x19   : > { %v265_v9 = vld [vmem:[%s259_s14] sm:$0xf]  ;;  %s253_s9 = sand.u32 1, %s649_s22  }
  0x1a   : > { %v376_v15 = vld [vmem:[%s263_s19] sm:$0xf]  ;;  %s500_s10 = sshll.u32 %s253_s9, 2  ;;  %s412_s17 = scalar_lea.sflag [#allocation3], %s253_s9 }
  0x1b   : > { %531 = vmatpush3.bf16.msra.mxu0 %v588_v4  ;;  %v377_v17 = vunpack.c.l.bf16 %v376_v15  ;;  %s255_s12 = scalar_lea.vmem [#allocation2], %s500_s10  ;;  %s599_s19 = sshll.u32 %s661_s25, 4  ;;  %s600_s19 = int_to_ptr.vmem [resolvable:$false] %s599_s19 }
  0x1c   : > { %532 = vmatprep.subr.bf16.mxu0 %v659_v1  ;;  %s425_s13 = sshll.u32 %s255_s12, 4  ;;  %s601_s20 = scalar_lea.vmem %s600_s19, 128  ;;  %s793_s13 = int_to_ptr.vmem [resolvable:$true] %s425_s13 }
  0x1d   : > { %s595_s18 = scalar_lea.vmem %s793_s13, 64  ;;  %p602_p0 = scmp.lt.s32.totalorder %s793_s13, %s600_s19 }
  0x1e   : > { %p596_p11 = scmp.ne.s32.totalorder %s793_s13, %s595_s18  ;;  %p603_p1 = scmp.lt.s32.totalorder %s601_s20, %s595_s18 }
  0x1f   : > { %533 = vmatpush3.bf16.msra.mxu0 %v589_v5 }
  0x20   : > { %534 = vmatprep.subr.bf16.mxu0 %v659_v1  ;;  %p597_p12 = pnand %p596_p11, %p735_p5  ;;  %p604_p2 = por %p603_p1, %p602_p0 }
  0x22   : > { %p598_p13 = pneg %p597_p12 }
  0x23   : > { %535 = vmatpush3.bf16.msra.mxu0 %v590_v6 }
  0x24   : > { %536 = vmatprep.subr.bf16.mxu0 %v659_v1  ;;  %p605_p3 = pnand %p604_p2, %p598_p13 }
  0x27   : > { %537 = vmatpush3.bf16.msra.mxu0 %v591_v7 }
  0x28   : > { %538 = vmatprep.subr.bf16.mxu0 %v659_v1 }
  0x2b   : > { %539 = vmatpush3.bf16.msra.mxu0 %v592_v8 }
  0x2e   : > { %541 = vmatmul.mubr.bf16.vlgmr.msra.gmra.mrb[0].mxu0 %v265_v9 }
 0x101   : > { %v370_v18 = vpop.f32.mrb[0].mxu0 }
 0x102   : > { %v371_v19 = vadd.f32 %v370_v18, %v287_v16  ;;  %v542_v20 = vpop.f32.mrb[1].mxu0 }
 0x103   : > { %v373_v21 = vpop.f32.mrb[2].mxu0 }
 0x104   : > { %v543_v22 = vpop.f32.mrb[3].mxu0  ;;  %v378_v23 = vadd.f32 %v377_v17, %v371_v19 }
 0x106   : > { %v380_v24 = vsel %vm379_vm1, %v378_v23, 0.0 }
 0x107   : > { %381 = vadd.xlane.f32.xlu0 %v380_v24 }
 0x194   : > { %v382_v25 = vpop.xlane.xlu0 %381 }
 0x195   : > { %v384_v26 = vmul.f32 0.03125, %v382_v25 }
 0x197   : > { %v385_v27 = vsub.f32 %v378_v23, %v384_v26 }
 0x199   : > { %v386_v28 = vmul.f32 %v385_v27, %v385_v27 }
 0x19b   : > { %v387_v29 = vsel %vm379_vm1, %v386_v28, 0.0 }
 0x19c   : > { %388 = vadd.xlane.f32.xlu0 %v387_v29 }
 0x229   : > { %v389_v30 = vpop.xlane.xlu0 %388 }
 0x22a   : > { %v390_v31 = vmul.f32 0.03125, %v389_v30 }
 0x22c   : > { %v391_v32 = vadd.f32 1e-12, %v390_v31 }
 0x22e   : > { %593 = vrsqrt.f32 %v391_v32 }
 0x238   : > { %v594_v38 = vpop.eup %593 }
 0x239   : > { %v395_v39 = vmul.f32 %v594_v38, %v385_v27 }
 0x23b   : > { %v400_v41 = vmul.f32 %v399_v37, %v395_v39 }
 0x23d   : > { %v407_v42 = vadd.f32 %v406_v40, %v400_v41 }
 0x23f   : > { %v408_v43 = vpack.c.bf16 %v407_v42, %v407_v42 }
 0x241   : > { %410 = vst.msk [vmem:[%s255_s12] sm:$0xf] %vm409_vm2, %v408_v43 }
 0x242   : > { %608 = shalt.err (!%p605_p3)
}
 0x243   : > { %s609_s26 = scalar_lea.hbm %s791_s16, 64  ;;  %s613_s9 = scalar_lea.hbm %s839_s6, 128 }
 0x244   : > { %p610_p4 = scmp.ne.s32.totalorder %s791_s16, %s609_s26  ;;  %p614_p9 = scmp.lt.u32.totalorder %s791_s16, %s839_s6 }
 0x245   : > { %p615_p10 = scmp.lt.u32.totalorder %s613_s9, %s609_s26  ;;  %p617_p12 = scmp.lt.u32.totalorder %s609_s26, %s791_s16 }
 0x246   : > { %p611_p7 = pnand %p610_p4, %p735_p5 }
 0x247   : > { %p616_p11 = por %p615_p10, %p614_p9 }
 0x248   : > { %p612_p8 = pneg %p611_p7 }
 0x249   : > { %p618_p13 = por %p617_p12, %p616_p11 }
 0x24b   : > { %p619_p0 = pnand %p618_p13, %p612_p8 }
 0x24d   : > { %622 = shalt.err (!%p619_p0)
}
 0x24e   : > { %544 = dma.vmem_to_hbm [thread:$0]  (%p735_p5), %s793_s13, 64, %s791_s16, %s412_s17  }
 0x24f PF: > { %p550_p1 = scmp.ge.s32.totalorder %s657_s24, 2  ;;  %s437_s12 = sand.u32 1, %s645_s21  }
 0x250   : > { %s438_s14 = scalar_lea.sflag [#allocation3], %s437_s12 }
 0x251   : > { %p547_p2 = pnand %p550_p1, %p739_p6 }
 0x253   : > { %640 = dma.done.wait (!%p547_p2), %s438_s14, 64  }
 0x254   : > { %642 = vsyncadd (!%p547_p2), %s438_s14, 4294967232  ;;  %p16_p3 = scmp.ge.s32.totalorder %s722_s27, 4   ;;  %s842_s21 = smov %s649_s22 }
 0x255   : > { %s843_s22 = smov %s653_s23  ;;  %s844_s23 = smov %s733_s30 }
 0x256   : > { %s845_s24 = smov %s722_s27  ;;  %18 = sbr.rel (!%p16_p3) target bundleno = 3 (0x3), region = 82 }
 0x25d   :  { %443 = vsyncpa [#allocation3], 1 }
 0x25e   :  { %445 = vsyncpa [#allocation3 + $0x1], 1 }

</bundles_post_ra>
